<compile_context>
chip_gen: v5e
topology: v5e:2x2
jax: 0.10.0
libtpu: 0.0.40
codegen_flags: <defaults>
</compile_context>

<pallas_src>
import math

import jax
import jax.numpy as jnp
import numpy as np
from jax import lax
from jax.experimental import pallas as pl
from jax.experimental.pallas import tpu as pltpu

# --- small "ExaoneConfig" -----------------------------------------------------
B, S = 2, 8            # batch, seq_len
E = 64                 # hidden_size
H = 4                  # num_attention_heads
KV = 2                 # num_key_value_heads (GQA)
D = E // H             # head_dim = 16
N_REP = H // KV        # num_key_value_groups
ROPE_THETA = 10000.0
NEG_INF = -1e30        # causal fill (exactly 0 probability after softmax)


# --- Pallas kernel: one batch element per grid step ---------------------------
def exaone_attn_kernel(hs_ref, wq_ref, wqr_ref, wk_ref, wkr_ref, wv_ref,
                       wo_ref, cos_ref, sin_ref, out_ref):
    """hs:(1,S,E) bf16 | wq/wqr:(H,E,D) bf16 (1/sqrt(D) folded, wqr = rotate_half-
    composed) | wk/wkr/wv:(KV,E,D) bf16 | wo:(H,D,E) bf16 | cos/sin:(1,S,D) f32
    | out:(1,S,E) f32."""
    x = hs_ref[0]            # (S, E) bf16
    cos = cos_ref[0]         # (S, D) f32
    sin = sin_ref[0]         # (S, D) f32

    # causal mask built in-kernel: no HBM->VMEM mask traffic.
    row = lax.broadcasted_iota(jnp.int32, (S, S), 0)
    col = lax.broadcasted_iota(jnp.int32, (S, S), 1)
    causal = row >= col

    acc = jnp.zeros((S, E), jnp.float32)
    for g in range(KV):                               # static unroll: kv heads
        # k/v projections land directly as (S, D) head tensors (MXU only).
        k_g = jnp.dot(x, wk_ref[g], preferred_element_type=jnp.float32)
        k_gr = jnp.dot(x, wkr_ref[g], preferred_element_type=jnp.float32)
        k_rope = k_g * cos + k_gr * sin               # RoPE, no lane shuffles
        v_g = jnp.dot(x, wv_ref[g],
                      preferred_element_type=jnp.float32).astype(jnp.bfloat16)

        for r in range(N_REP):                        # q heads sharing kv head g
            h = g * N_REP + r
            q_h = jnp.dot(x, wq_ref[h], preferred_element_type=jnp.float32)
            q_hr = jnp.dot(x, wqr_ref[h], preferred_element_type=jnp.float32)
            q_rope = q_h * cos + q_hr * sin           # scale already in wq/wqr

            # scores: contract over D on both operands (no materialized k^T).
            s = lax.dot_general(q_rope, k_rope, (((1,), (1,)), ((), ())),
                                preferred_element_type=jnp.float32)  # (S, S)
            s = jnp.where(causal, s, NEG_INF)
            s = s - jnp.max(s, axis=-1, keepdims=True)
            p = jnp.exp(s)
            p = p * pl.reciprocal(jnp.sum(p, axis=-1, keepdims=True), approx=True)

            o_h = jnp.dot(p.astype(jnp.bfloat16), v_g,
                          preferred_element_type=jnp.float32)        # (S, D)
            # accumulate against the matching rows of out_proj: no head concat.
            acc = acc + jnp.dot(o_h.astype(jnp.bfloat16), wo_ref[h],
                                preferred_element_type=jnp.float32)

    out_ref[0] = acc


# --- one-time (load-time) parameter transform ---------------------------------
def prepare_params(wq, wk, wv, wo):
    """Head-major bf16 slabs, 1/sqrt(D) folded into q, rotate_half folded into
    extra q/k slabs.  In a real model this is done once when loading weights."""
    scale = 1.0 / math.sqrt(D)

    def to_heads(w, n_heads):          # (E, n_heads*D) -> (n_heads, E, D)
        return jnp.transpose(w.reshape(E, n_heads, D), (1, 0, 2))

    def fold_rotate(w_heads):          # x @ fold_rotate(w) == rotate_half(x @ w)
        return jnp.concatenate([-w_heads[..., D // 2:], w_heads[..., :D // 2]],
                               axis=-1)

    wq_h = to_heads(wq, H) * scale
    wk_h = to_heads(wk, KV)
    return dict(
        wq=wq_h.astype(jnp.bfloat16),
        wqr=fold_rotate(wq_h).astype(jnp.bfloat16),
        wk=wk_h.astype(jnp.bfloat16),
        wkr=fold_rotate(wk_h).astype(jnp.bfloat16),
        wv=to_heads(wv, KV).astype(jnp.bfloat16),
        wo=wo.reshape(H, D, E).astype(jnp.bfloat16),
    )


def exaone_attention(hidden_states, params, cos, sin):
    """hidden_states: (B,S,E) f32; cos/sin: (B,S,D) f32; params from prepare_params."""
    hs = hidden_states.astype(jnp.bfloat16)
    return pl.pallas_call(
        exaone_attn_kernel,
        out_shape=jax.ShapeDtypeStruct((B, S, E), jnp.float32),
        grid_spec=pltpu.PrefetchScalarGridSpec(
            num_scalar_prefetch=0,
            grid=(B,),
            in_specs=[
                pl.BlockSpec((1, S, E), lambda b: (b, 0, 0)),      # hidden
                pl.BlockSpec((H, E, D), lambda b: (0, 0, 0)),      # wq
                pl.BlockSpec((H, E, D), lambda b: (0, 0, 0)),      # wq (rotated)
                pl.BlockSpec((KV, E, D), lambda b: (0, 0, 0)),     # wk
                pl.BlockSpec((KV, E, D), lambda b: (0, 0, 0)),     # wk (rotated)
                pl.BlockSpec((KV, E, D), lambda b: (0, 0, 0)),     # wv
                pl.BlockSpec((H, D, E), lambda b: (0, 0, 0)),      # wo (row slabs)
                pl.BlockSpec((1, S, D), lambda b: (b, 0, 0)),      # cos
                pl.BlockSpec((1, S, D), lambda b: (b, 0, 0)),      # sin
            ],
            out_specs=pl.BlockSpec((1, S, E), lambda b: (b, 0, 0)),
        ),
        compiler_params=pltpu.CompilerParams(dimension_semantics=("parallel",)),
    )(hs, params["wq"], params["wqr"], params["wk"], params["wkr"],
      params["wv"], params["wo"], cos, sin)


# --- pure-JAX reference (mirrors ExaoneSelfAttention.forward, all f32) --------
def _rotate_half(x):
    half = x.shape[-1] // 2
    return jnp.concatenate([-x[..., half:], x[..., :half]], axis=-1)


def reference(hidden_states, wq, wk, wv, wo, cos, sin):
    q = hidden_states @ wq                                   # (B,S,H*D)
    k = hidden_states @ wk                                   # (B,S,KV*D)
    v = hidden_states @ wv
    q = q.reshape(B, S, H, D).transpose(0, 2, 1, 3)          # (B,H,S,D)
    k = k.reshape(B, S, KV, D).transpose(0, 2, 1, 3)         # (B,KV,S,D)
    v = v.reshape(B, S, KV, D).transpose(0, 2, 1, 3)
    c = cos[:, None]
    s_ = sin[:, None]
    q = q * c + _rotate_half(q) * s_
    k = k * c + _rotate_half(k) * s_
    k = jnp.repeat(k, N_REP, axis=1)                          # repeat_kv
    v = jnp.repeat(v, N_REP, axis=1)
    scores = jnp.einsum("bhqd,bhkd->bhqk", q, k) / math.sqrt(D)
    causal = jnp.where(jnp.tril(jnp.ones((S, S), dtype=bool)), 0.0, -1e9)
    scores = scores + causal[None, None]
    p = jax.nn.softmax(scores.astype(jnp.float32), axis=-1)
    o = jnp.einsum("bhqk,bhkd->bhqd", p, v)
    o = o.transpose(0, 2, 1, 3).reshape(B, S, E)
    return o @ wo


if __name__ == "__main__":
    key = jax.random.PRNGKey(0)
    k_hs, k_q, k_k, k_v, k_o = jax.random.split(key, 5)

    hidden_states = jax.random.normal(k_hs, (B, S, E), dtype=jnp.float32)
    # nn.Linear stores weight (out,in) with y = x @ W.T -> store (in,out) directly
    wq = 0.02 * jax.random.normal(k_q, (E, H * D), dtype=jnp.float32)
    wk = 0.02 * jax.random.normal(k_k, (E, KV * D), dtype=jnp.float32)
    wv = 0.02 * jax.random.normal(k_v, (E, KV * D), dtype=jnp.float32)
    wo = 0.02 * jax.random.normal(k_o, (E, E), dtype=jnp.float32)

    # default rotary embedding (rope_type="default", attention_scaling=1.0)
    positions = jnp.arange(S, dtype=jnp.float32)
    inv_freq = 1.0 / (ROPE_THETA ** (jnp.arange(0, D, 2, dtype=jnp.float32) / D))
    freqs = positions[:, None] * inv_freq[None, :]            # (S, D/2)
    emb = jnp.concatenate([freqs, freqs], axis=-1)            # (S, D)
    cos = jnp.broadcast_to(jnp.cos(emb)[None], (B, S, D)).astype(jnp.float32)
    sin = jnp.broadcast_to(jnp.sin(emb)[None], (B, S, D)).astype(jnp.float32)

    # TODO(synk): attention_dropout, KV-cache (past_key_value), dynamic-RoPE
    # refresh and arbitrary (padding) attention masks are not implemented —
    # the kernel implements the standard causal inference path.

    params = prepare_params(wq, wk, wv, wo)
    out = exaone_attention(hidden_states, params, cos, sin)
    out = jax.block_until_ready(out)

    ref = reference(hidden_states, wq, wk, wv, wo, cos, sin)
    np.testing.assert_allclose(np.asarray(out), np.asarray(ref),
                               rtol=2e-2, atol=2e-2)
    print("KERNEL_OK")
</pallas_src>

<mosaic_0001>
module attributes {stable_mosaic.version = 11 : i64} {
  func.func @exaone_attn_kernel(%arg0: i32, %arg1: memref<1x8x64xbf16, #tpu.memory_space<vmem>>, %arg2: memref<4x64x16xbf16, #tpu.memory_space<vmem>>, %arg3: memref<4x64x16xbf16, #tpu.memory_space<vmem>>, %arg4: memref<2x64x16xbf16, #tpu.memory_space<vmem>>, %arg5: memref<2x64x16xbf16, #tpu.memory_space<vmem>>, %arg6: memref<2x64x16xbf16, #tpu.memory_space<vmem>>, %arg7: memref<4x16x64xbf16, #tpu.memory_space<vmem>>, %arg8: memref<1x8x16xf32, #tpu.memory_space<vmem>>, %arg9: memref<1x8x16xf32, #tpu.memory_space<vmem>>, %arg10: memref<1x8x64xf32, #tpu.memory_space<vmem>>) attributes {dimension_semantics = [#tpu.dimension_semantics<parallel>], iteration_bounds = array<i64: 2>, scalar_prefetch = 0 : i64, scratch_operands = 0 : i64, tpu.core_type = #tpu.core_type<tc>, window_params = [{transform_indices = @transform_0, window_bounds = array<i64: 1, 8, 64>}, {pipeline_mode = #tpu.pipeline_mode<synchronous>, transform_indices = @transform_1, window_bounds = array<i64: 4, 64, 16>}, {pipeline_mode = #tpu.pipeline_mode<synchronous>, transform_indices = @transform_2, window_bounds = array<i64: 4, 64, 16>}, {pipeline_mode = #tpu.pipeline_mode<synchronous>, transform_indices = @transform_3, window_bounds = array<i64: 2, 64, 16>}, {pipeline_mode = #tpu.pipeline_mode<synchronous>, transform_indices = @transform_4, window_bounds = array<i64: 2, 64, 16>}, {pipeline_mode = #tpu.pipeline_mode<synchronous>, transform_indices = @transform_5, window_bounds = array<i64: 2, 64, 16>}, {pipeline_mode = #tpu.pipeline_mode<synchronous>, transform_indices = @transform_6, window_bounds = array<i64: 4, 16, 64>}, {transform_indices = @transform_7, window_bounds = array<i64: 1, 8, 16>}, {transform_indices = @transform_8, window_bounds = array<i64: 1, 8, 16>}, {transform_indices = @transform_9, window_bounds = array<i64: 1, 8, 64>}]} {
    %c0 = arith.constant 0 : index
    %c0_0 = arith.constant 0 : index
    %c0_1 = arith.constant 0 : index
    %0 = vector.load %arg1[%c0, %c0_0, %c0_1] : memref<1x8x64xbf16, #tpu.memory_space<vmem>>, vector<1x8x64xbf16>
    %1 = vector.shape_cast %0 : vector<1x8x64xbf16> to vector<8x64xbf16>
    %c0_2 = arith.constant 0 : index
    %c0_3 = arith.constant 0 : index
    %c0_4 = arith.constant 0 : index
    %2 = vector.load %arg8[%c0_2, %c0_3, %c0_4] : memref<1x8x16xf32, #tpu.memory_space<vmem>>, vector<1x8x16xf32>
    %3 = vector.shape_cast %2 : vector<1x8x16xf32> to vector<8x16xf32>
    %c0_5 = arith.constant 0 : index
    %c0_6 = arith.constant 0 : index
    %c0_7 = arith.constant 0 : index
    %4 = vector.load %arg9[%c0_5, %c0_6, %c0_7] : memref<1x8x16xf32, #tpu.memory_space<vmem>>, vector<1x8x16xf32>
    %5 = vector.shape_cast %4 : vector<1x8x16xf32> to vector<8x16xf32>
    %6 = tpu.iota {dimensions = array<i32: 0>} : vector<8x8xi32>
    %7 = tpu.iota {dimensions = array<i32: 1>} : vector<8x8xi32>
    %8 = arith.cmpi sge, %6, %7 : vector<8x8xi32>
    %cst = arith.constant 0.000000e+00 : f32
    %9 = vector.broadcast %cst : f32 to vector<8x64xf32>
    %c0_8 = arith.constant 0 : index
    %c0_9 = arith.constant 0 : index
    %c0_10 = arith.constant 0 : index
    %10 = vector.load %arg4[%c0_8, %c0_9, %c0_10] : memref<2x64x16xbf16, #tpu.memory_space<vmem>>, vector<1x64x16xbf16>
    %11 = vector.shape_cast %10 : vector<1x64x16xbf16> to vector<64x16xbf16>
    %cst_11 = arith.constant dense<0.000000e+00> : vector<8x16xf32>
    %12 = tpu.matmul %1, %11, %cst_11 {dimension_numbers = #tpu.dot_dimension_numbers<[1], [0], [0], [1], [0, 0, 1, 1], [], []>} : vector<8x64xbf16>, vector<64x16xbf16>, vector<8x16xf32> -> vector<8x16xf32>
    %c0_12 = arith.constant 0 : index
    %c0_13 = arith.constant 0 : index
    %c0_14 = arith.constant 0 : index
    %13 = vector.load %arg5[%c0_12, %c0_13, %c0_14] : memref<2x64x16xbf16, #tpu.memory_space<vmem>>, vector<1x64x16xbf16>
    %14 = vector.shape_cast %13 : vector<1x64x16xbf16> to vector<64x16xbf16>
    %cst_15 = arith.constant dense<0.000000e+00> : vector<8x16xf32>
    %15 = tpu.matmul %1, %14, %cst_15 {dimension_numbers = #tpu.dot_dimension_numbers<[1], [0], [0], [1], [0, 0, 1, 1], [], []>} : vector<8x64xbf16>, vector<64x16xbf16>, vector<8x16xf32> -> vector<8x16xf32>
    %16 = arith.mulf %12, %3 : vector<8x16xf32>
    %17 = arith.mulf %15, %5 : vector<8x16xf32>
    %18 = arith.addf %16, %17 : vector<8x16xf32>
    %c0_16 = arith.constant 0 : index
    %c0_17 = arith.constant 0 : index
    %c0_18 = arith.constant 0 : index
    %19 = vector.load %arg6[%c0_16, %c0_17, %c0_18] : memref<2x64x16xbf16, #tpu.memory_space<vmem>>, vector<1x64x16xbf16>
    %20 = vector.shape_cast %19 : vector<1x64x16xbf16> to vector<64x16xbf16>
    %cst_19 = arith.constant dense<0.000000e+00> : vector<8x16xf32>
    %21 = tpu.matmul %1, %20, %cst_19 {dimension_numbers = #tpu.dot_dimension_numbers<[1], [0], [0], [1], [0, 0, 1, 1], [], []>} : vector<8x64xbf16>, vector<64x16xbf16>, vector<8x16xf32> -> vector<8x16xf32>
    %22 = arith.truncf %21 : vector<8x16xf32> to vector<8x16xbf16>
    %c0_20 = arith.constant 0 : index
    %c0_21 = arith.constant 0 : index
    %c0_22 = arith.constant 0 : index
    %23 = vector.load %arg2[%c0_20, %c0_21, %c0_22] : memref<4x64x16xbf16, #tpu.memory_space<vmem>>, vector<1x64x16xbf16>
    %24 = vector.shape_cast %23 : vector<1x64x16xbf16> to vector<64x16xbf16>
    %cst_23 = arith.constant dense<0.000000e+00> : vector<8x16xf32>
    %25 = tpu.matmul %1, %24, %cst_23 {dimension_numbers = #tpu.dot_dimension_numbers<[1], [0], [0], [1], [0, 0, 1, 1], [], []>} : vector<8x64xbf16>, vector<64x16xbf16>, vector<8x16xf32> -> vector<8x16xf32>
    %c0_24 = arith.constant 0 : index
    %c0_25 = arith.constant 0 : index
    %c0_26 = arith.constant 0 : index
    %26 = vector.load %arg3[%c0_24, %c0_25, %c0_26] : memref<4x64x16xbf16, #tpu.memory_space<vmem>>, vector<1x64x16xbf16>
    %27 = vector.shape_cast %26 : vector<1x64x16xbf16> to vector<64x16xbf16>
    %cst_27 = arith.constant dense<0.000000e+00> : vector<8x16xf32>
    %28 = tpu.matmul %1, %27, %cst_27 {dimension_numbers = #tpu.dot_dimension_numbers<[1], [0], [0], [1], [0, 0, 1, 1], [], []>} : vector<8x64xbf16>, vector<64x16xbf16>, vector<8x16xf32> -> vector<8x16xf32>
    %29 = arith.mulf %25, %3 : vector<8x16xf32>
    %30 = arith.mulf %28, %5 : vector<8x16xf32>
    %31 = arith.addf %29, %30 : vector<8x16xf32>
    %cst_28 = arith.constant dense<0.000000e+00> : vector<8x8xf32>
    %32 = tpu.matmul %31, %18, %cst_28 {dimension_numbers = #tpu.dot_dimension_numbers<[1], [1], [0], [0], [0, 0, 1, 0], [], []>} : vector<8x16xf32>, vector<8x16xf32>, vector<8x8xf32> -> vector<8x8xf32>
    %cst_29 = arith.constant -1.000000e+30 : f32
    %33 = vector.broadcast %cst_29 : f32 to vector<8x8xf32>
    %34 = arith.select %8, %32, %33 : vector<8x8xi1>, vector<8x8xf32>
    %cst_30 = arith.constant dense<0xFF800000> : vector<8xf32>
    %35 = vector.multi_reduction <maximumf>, %34, %cst_30 [1] : vector<8x8xf32> to vector<8xf32>
    %36 = vector.shape_cast %35 : vector<8xf32> to vector<8x1xf32>
    %37 = vector.broadcast %36 : vector<8x1xf32> to vector<8x8xf32>
    %38 = arith.subf %34, %37 : vector<8x8xf32>
    %39 = math.exp %38 : vector<8x8xf32>
    %cst_31 = arith.constant dense<0.000000e+00> : vector<8xf32>
    %40 = vector.multi_reduction <add>, %39, %cst_31 [1] : vector<8x8xf32> to vector<8xf32>
    %41 = vector.shape_cast %40 : vector<8xf32> to vector<8x1xf32>
    %42 = tpu.reciprocal %41 {approx = true} : vector<8x1xf32> -> vector<8x1xf32>
    %43 = vector.broadcast %42 : vector<8x1xf32> to vector<8x8xf32>
    %44 = arith.mulf %39, %43 : vector<8x8xf32>
    %45 = arith.truncf %44 : vector<8x8xf32> to vector<8x8xbf16>
    %cst_32 = arith.constant dense<0.000000e+00> : vector<8x16xf32>
    %46 = tpu.matmul %45, %22, %cst_32 {dimension_numbers = #tpu.dot_dimension_numbers<[1], [0], [0], [1], [0, 0, 1, 1], [], []>} : vector<8x8xbf16>, vector<8x16xbf16>, vector<8x16xf32> -> vector<8x16xf32>
    %47 = arith.truncf %46 : vector<8x16xf32> to vector<8x16xbf16>
    %c0_33 = arith.constant 0 : index
    %c0_34 = arith.constant 0 : index
    %c0_35 = arith.constant 0 : index
    %48 = vector.load %arg7[%c0_33, %c0_34, %c0_35] : memref<4x16x64xbf16, #tpu.memory_space<vmem>>, vector<1x16x64xbf16>
    %49 = vector.shape_cast %48 : vector<1x16x64xbf16> to vector<16x64xbf16>
    %cst_36 = arith.constant dense<0.000000e+00> : vector<8x64xf32>
    %50 = tpu.matmul %47, %49, %cst_36 {dimension_numbers = #tpu.dot_dimension_numbers<[1], [0], [0], [1], [0, 0, 1, 1], [], []>} : vector<8x16xbf16>, vector<16x64xbf16>, vector<8x64xf32> -> vector<8x64xf32>
    %51 = arith.addf %9, %50 : vector<8x64xf32>
    %c1 = arith.constant 1 : index
    %c0_37 = arith.constant 0 : index
    %c0_38 = arith.constant 0 : index
    %52 = vector.load %arg2[%c1, %c0_37, %c0_38] : memref<4x64x16xbf16, #tpu.memory_space<vmem>>, vector<1x64x16xbf16>
    %53 = vector.shape_cast %52 : vector<1x64x16xbf16> to vector<64x16xbf16>
    %cst_39 = arith.constant dense<0.000000e+00> : vector<8x16xf32>
    %54 = tpu.matmul %1, %53, %cst_39 {dimension_numbers = #tpu.dot_dimension_numbers<[1], [0], [0], [1], [0, 0, 1, 1], [], []>} : vector<8x64xbf16>, vector<64x16xbf16>, vector<8x16xf32> -> vector<8x16xf32>
    %c1_40 = arith.constant 1 : index
    %c0_41 = arith.constant 0 : index
    %c0_42 = arith.constant 0 : index
    %55 = vector.load %arg3[%c1_40, %c0_41, %c0_42] : memref<4x64x16xbf16, #tpu.memory_space<vmem>>, vector<1x64x16xbf16>
    %56 = vector.shape_cast %55 : vector<1x64x16xbf16> to vector<64x16xbf16>
    %cst_43 = arith.constant dense<0.000000e+00> : vector<8x16xf32>
    %57 = tpu.matmul %1, %56, %cst_43 {dimension_numbers = #tpu.dot_dimension_numbers<[1], [0], [0], [1], [0, 0, 1, 1], [], []>} : vector<8x64xbf16>, vector<64x16xbf16>, vector<8x16xf32> -> vector<8x16xf32>
    %58 = arith.mulf %54, %3 : vector<8x16xf32>
    %59 = arith.mulf %57, %5 : vector<8x16xf32>
    %60 = arith.addf %58, %59 : vector<8x16xf32>
    %cst_44 = arith.constant dense<0.000000e+00> : vector<8x8xf32>
    %61 = tpu.matmul %60, %18, %cst_44 {dimension_numbers = #tpu.dot_dimension_numbers<[1], [1], [0], [0], [0, 0, 1, 0], [], []>} : vector<8x16xf32>, vector<8x16xf32>, vector<8x8xf32> -> vector<8x8xf32>
    %cst_45 = arith.constant -1.000000e+30 : f32
    %62 = vector.broadcast %cst_45 : f32 to vector<8x8xf32>
    %63 = arith.select %8, %61, %62 : vector<8x8xi1>, vector<8x8xf32>
    %cst_46 = arith.constant dense<0xFF800000> : vector<8xf32>
    %64 = vector.multi_reduction <maximumf>, %63, %cst_46 [1] : vector<8x8xf32> to vector<8xf32>
    %65 = vector.shape_cast %64 : vector<8xf32> to vector<8x1xf32>
    %66 = vector.broadcast %65 : vector<8x1xf32> to vector<8x8xf32>
    %67 = arith.subf %63, %66 : vector<8x8xf32>
    %68 = math.exp %67 : vector<8x8xf32>
    %cst_47 = arith.constant dense<0.000000e+00> : vector<8xf32>
    %69 = vector.multi_reduction <add>, %68, %cst_47 [1] : vector<8x8xf32> to vector<8xf32>
    %70 = vector.shape_cast %69 : vector<8xf32> to vector<8x1xf32>
    %71 = tpu.reciprocal %70 {approx = true} : vector<8x1xf32> -> vector<8x1xf32>
    %72 = vector.broadcast %71 : vector<8x1xf32> to vector<8x8xf32>
    %73 = arith.mulf %68, %72 : vector<8x8xf32>
    %74 = arith.truncf %73 : vector<8x8xf32> to vector<8x8xbf16>
    %cst_48 = arith.constant dense<0.000000e+00> : vector<8x16xf32>
    %75 = tpu.matmul %74, %22, %cst_48 {dimension_numbers = #tpu.dot_dimension_numbers<[1], [0], [0], [1], [0, 0, 1, 1], [], []>} : vector<8x8xbf16>, vector<8x16xbf16>, vector<8x16xf32> -> vector<8x16xf32>
    %76 = arith.truncf %75 : vector<8x16xf32> to vector<8x16xbf16>
    %c1_49 = arith.constant 1 : index
    %c0_50 = arith.constant 0 : index
    %c0_51 = arith.constant 0 : index
    %77 = vector.load %arg7[%c1_49, %c0_50, %c0_51] : memref<4x16x64xbf16, #tpu.memory_space<vmem>>, vector<1x16x64xbf16>
    %78 = vector.shape_cast %77 : vector<1x16x64xbf16> to vector<16x64xbf16>
    %cst_52 = arith.constant dense<0.000000e+00> : vector<8x64xf32>
    %79 = tpu.matmul %76, %78, %cst_52 {dimension_numbers = #tpu.dot_dimension_numbers<[1], [0], [0], [1], [0, 0, 1, 1], [], []>} : vector<8x16xbf16>, vector<16x64xbf16>, vector<8x64xf32> -> vector<8x64xf32>
    %80 = arith.addf %51, %79 : vector<8x64xf32>
    %c1_53 = arith.constant 1 : index
    %c0_54 = arith.constant 0 : index
    %c0_55 = arith.constant 0 : index
    %81 = vector.load %arg4[%c1_53, %c0_54, %c0_55] : memref<2x64x16xbf16, #tpu.memory_space<vmem>>, vector<1x64x16xbf16>
    %82 = vector.shape_cast %81 : vector<1x64x16xbf16> to vector<64x16xbf16>
    %cst_56 = arith.constant dense<0.000000e+00> : vector<8x16xf32>
    %83 = tpu.matmul %1, %82, %cst_56 {dimension_numbers = #tpu.dot_dimension_numbers<[1], [0], [0], [1], [0, 0, 1, 1], [], []>} : vector<8x64xbf16>, vector<64x16xbf16>, vector<8x16xf32> -> vector<8x16xf32>
    %c1_57 = arith.constant 1 : index
    %c0_58 = arith.constant 0 : index
    %c0_59 = arith.constant 0 : index
    %84 = vector.load %arg5[%c1_57, %c0_58, %c0_59] : memref<2x64x16xbf16, #tpu.memory_space<vmem>>, vector<1x64x16xbf16>
    %85 = vector.shape_cast %84 : vector<1x64x16xbf16> to vector<64x16xbf16>
    %cst_60 = arith.constant dense<0.000000e+00> : vector<8x16xf32>
    %86 = tpu.matmul %1, %85, %cst_60 {dimension_numbers = #tpu.dot_dimension_numbers<[1], [0], [0], [1], [0, 0, 1, 1], [], []>} : vector<8x64xbf16>, vector<64x16xbf16>, vector<8x16xf32> -> vector<8x16xf32>
    %87 = arith.mulf %83, %3 : vector<8x16xf32>
    %88 = arith.mulf %86, %5 : vector<8x16xf32>
    %89 = arith.addf %87, %88 : vector<8x16xf32>
    %c1_61 = arith.constant 1 : index
    %c0_62 = arith.constant 0 : index
    %c0_63 = arith.constant 0 : index
    %90 = vector.load %arg6[%c1_61, %c0_62, %c0_63] : memref<2x64x16xbf16, #tpu.memory_space<vmem>>, vector<1x64x16xbf16>
    %91 = vector.shape_cast %90 : vector<1x64x16xbf16> to vector<64x16xbf16>
    %cst_64 = arith.constant dense<0.000000e+00> : vector<8x16xf32>
    %92 = tpu.matmul %1, %91, %cst_64 {dimension_numbers = #tpu.dot_dimension_numbers<[1], [0], [0], [1], [0, 0, 1, 1], [], []>} : vector<8x64xbf16>, vector<64x16xbf16>, vector<8x16xf32> -> vector<8x16xf32>
    %93 = arith.truncf %92 : vector<8x16xf32> to vector<8x16xbf16>
    %c2 = arith.constant 2 : index
    %c0_65 = arith.constant 0 : index
    %c0_66 = arith.constant 0 : index
    %94 = vector.load %arg2[%c2, %c0_65, %c0_66] : memref<4x64x16xbf16, #tpu.memory_space<vmem>>, vector<1x64x16xbf16>
    %95 = vector.shape_cast %94 : vector<1x64x16xbf16> to vector<64x16xbf16>
    %cst_67 = arith.constant dense<0.000000e+00> : vector<8x16xf32>
    %96 = tpu.matmul %1, %95, %cst_67 {dimension_numbers = #tpu.dot_dimension_numbers<[1], [0], [0], [1], [0, 0, 1, 1], [], []>} : vector<8x64xbf16>, vector<64x16xbf16>, vector<8x16xf32> -> vector<8x16xf32>
    %c2_68 = arith.constant 2 : index
    %c0_69 = arith.constant 0 : index
    %c0_70 = arith.constant 0 : index
    %97 = vector.load %arg3[%c2_68, %c0_69, %c0_70] : memref<4x64x16xbf16, #tpu.memory_space<vmem>>, vector<1x64x16xbf16>
    %98 = vector.shape_cast %97 : vector<1x64x16xbf16> to vector<64x16xbf16>
    %cst_71 = arith.constant dense<0.000000e+00> : vector<8x16xf32>
    %99 = tpu.matmul %1, %98, %cst_71 {dimension_numbers = #tpu.dot_dimension_numbers<[1], [0], [0], [1], [0, 0, 1, 1], [], []>} : vector<8x64xbf16>, vector<64x16xbf16>, vector<8x16xf32> -> vector<8x16xf32>
    %100 = arith.mulf %96, %3 : vector<8x16xf32>
    %101 = arith.mulf %99, %5 : vector<8x16xf32>
    %102 = arith.addf %100, %101 : vector<8x16xf32>
    %cst_72 = arith.constant dense<0.000000e+00> : vector<8x8xf32>
    %103 = tpu.matmul %102, %89, %cst_72 {dimension_numbers = #tpu.dot_dimension_numbers<[1], [1], [0], [0], [0, 0, 1, 0], [], []>} : vector<8x16xf32>, vector<8x16xf32>, vector<8x8xf32> -> vector<8x8xf32>
    %cst_73 = arith.constant -1.000000e+30 : f32
    %104 = vector.broadcast %cst_73 : f32 to vector<8x8xf32>
    %105 = arith.select %8, %103, %104 : vector<8x8xi1>, vector<8x8xf32>
    %cst_74 = arith.constant dense<0xFF800000> : vector<8xf32>
    %106 = vector.multi_reduction <maximumf>, %105, %cst_74 [1] : vector<8x8xf32> to vector<8xf32>
    %107 = vector.shape_cast %106 : vector<8xf32> to vector<8x1xf32>
    %108 = vector.broadcast %107 : vector<8x1xf32> to vector<8x8xf32>
    %109 = arith.subf %105, %108 : vector<8x8xf32>
    %110 = math.exp %109 : vector<8x8xf32>
    %cst_75 = arith.constant dense<0.000000e+00> : vector<8xf32>
    %111 = vector.multi_reduction <add>, %110, %cst_75 [1] : vector<8x8xf32> to vector<8xf32>
    %112 = vector.shape_cast %111 : vector<8xf32> to vector<8x1xf32>
    %113 = tpu.reciprocal %112 {approx = true} : vector<8x1xf32> -> vector<8x1xf32>
    %114 = vector.broadcast %113 : vector<8x1xf32> to vector<8x8xf32>
    %115 = arith.mulf %110, %114 : vector<8x8xf32>
    %116 = arith.truncf %115 : vector<8x8xf32> to vector<8x8xbf16>
    %cst_76 = arith.constant dense<0.000000e+00> : vector<8x16xf32>
    %117 = tpu.matmul %116, %93, %cst_76 {dimension_numbers = #tpu.dot_dimension_numbers<[1], [0], [0], [1], [0, 0, 1, 1], [], []>} : vector<8x8xbf16>, vector<8x16xbf16>, vector<8x16xf32> -> vector<8x16xf32>
    %118 = arith.truncf %117 : vector<8x16xf32> to vector<8x16xbf16>
    %c2_77 = arith.constant 2 : index
    %c0_78 = arith.constant 0 : index
    %c0_79 = arith.constant 0 : index
    %119 = vector.load %arg7[%c2_77, %c0_78, %c0_79] : memref<4x16x64xbf16, #tpu.memory_space<vmem>>, vector<1x16x64xbf16>
    %120 = vector.shape_cast %119 : vector<1x16x64xbf16> to vector<16x64xbf16>
    %cst_80 = arith.constant dense<0.000000e+00> : vector<8x64xf32>
    %121 = tpu.matmul %118, %120, %cst_80 {dimension_numbers = #tpu.dot_dimension_numbers<[1], [0], [0], [1], [0, 0, 1, 1], [], []>} : vector<8x16xbf16>, vector<16x64xbf16>, vector<8x64xf32> -> vector<8x64xf32>
    %122 = arith.addf %80, %121 : vector<8x64xf32>
    %c3 = arith.constant 3 : index
    %c0_81 = arith.constant 0 : index
    %c0_82 = arith.constant 0 : index
    %123 = vector.load %arg2[%c3, %c0_81, %c0_82] : memref<4x64x16xbf16, #tpu.memory_space<vmem>>, vector<1x64x16xbf16>
    %124 = vector.shape_cast %123 : vector<1x64x16xbf16> to vector<64x16xbf16>
    %cst_83 = arith.constant dense<0.000000e+00> : vector<8x16xf32>
    %125 = tpu.matmul %1, %124, %cst_83 {dimension_numbers = #tpu.dot_dimension_numbers<[1], [0], [0], [1], [0, 0, 1, 1], [], []>} : vector<8x64xbf16>, vector<64x16xbf16>, vector<8x16xf32> -> vector<8x16xf32>
    %c3_84 = arith.constant 3 : index
    %c0_85 = arith.constant 0 : index
    %c0_86 = arith.constant 0 : index
    %126 = vector.load %arg3[%c3_84, %c0_85, %c0_86] : memref<4x64x16xbf16, #tpu.memory_space<vmem>>, vector<1x64x16xbf16>
    %127 = vector.shape_cast %126 : vector<1x64x16xbf16> to vector<64x16xbf16>
    %cst_87 = arith.constant dense<0.000000e+00> : vector<8x16xf32>
    %128 = tpu.matmul %1, %127, %cst_87 {dimension_numbers = #tpu.dot_dimension_numbers<[1], [0], [0], [1], [0, 0, 1, 1], [], []>} : vector<8x64xbf16>, vector<64x16xbf16>, vector<8x16xf32> -> vector<8x16xf32>
    %129 = arith.mulf %125, %3 : vector<8x16xf32>
    %130 = arith.mulf %128, %5 : vector<8x16xf32>
    %131 = arith.addf %129, %130 : vector<8x16xf32>
    %cst_88 = arith.constant dense<0.000000e+00> : vector<8x8xf32>
    %132 = tpu.matmul %131, %89, %cst_88 {dimension_numbers = #tpu.dot_dimension_numbers<[1], [1], [0], [0], [0, 0, 1, 0], [], []>} : vector<8x16xf32>, vector<8x16xf32>, vector<8x8xf32> -> vector<8x8xf32>
    %cst_89 = arith.constant -1.000000e+30 : f32
    %133 = vector.broadcast %cst_89 : f32 to vector<8x8xf32>
    %134 = arith.select %8, %132, %133 : vector<8x8xi1>, vector<8x8xf32>
    %cst_90 = arith.constant dense<0xFF800000> : vector<8xf32>
    %135 = vector.multi_reduction <maximumf>, %134, %cst_90 [1] : vector<8x8xf32> to vector<8xf32>
    %136 = vector.shape_cast %135 : vector<8xf32> to vector<8x1xf32>
    %137 = vector.broadcast %136 : vector<8x1xf32> to vector<8x8xf32>
    %138 = arith.subf %134, %137 : vector<8x8xf32>
    %139 = math.exp %138 : vector<8x8xf32>
    %cst_91 = arith.constant dense<0.000000e+00> : vector<8xf32>
    %140 = vector.multi_reduction <add>, %139, %cst_91 [1] : vector<8x8xf32> to vector<8xf32>
    %141 = vector.shape_cast %140 : vector<8xf32> to vector<8x1xf32>
    %142 = tpu.reciprocal %141 {approx = true} : vector<8x1xf32> -> vector<8x1xf32>
    %143 = vector.broadcast %142 : vector<8x1xf32> to vector<8x8xf32>
    %144 = arith.mulf %139, %143 : vector<8x8xf32>
    %145 = arith.truncf %144 : vector<8x8xf32> to vector<8x8xbf16>
    %cst_92 = arith.constant dense<0.000000e+00> : vector<8x16xf32>
    %146 = tpu.matmul %145, %93, %cst_92 {dimension_numbers = #tpu.dot_dimension_numbers<[1], [0], [0], [1], [0, 0, 1, 1], [], []>} : vector<8x8xbf16>, vector<8x16xbf16>, vector<8x16xf32> -> vector<8x16xf32>
    %147 = arith.truncf %146 : vector<8x16xf32> to vector<8x16xbf16>
    %c3_93 = arith.constant 3 : index
    %c0_94 = arith.constant 0 : index
    %c0_95 = arith.constant 0 : index
    %148 = vector.load %arg7[%c3_93, %c0_94, %c0_95] : memref<4x16x64xbf16, #tpu.memory_space<vmem>>, vector<1x16x64xbf16>
    %149 = vector.shape_cast %148 : vector<1x16x64xbf16> to vector<16x64xbf16>
    %cst_96 = arith.constant dense<0.000000e+00> : vector<8x64xf32>
    %150 = tpu.matmul %147, %149, %cst_96 {dimension_numbers = #tpu.dot_dimension_numbers<[1], [0], [0], [1], [0, 0, 1, 1], [], []>} : vector<8x16xbf16>, vector<16x64xbf16>, vector<8x64xf32> -> vector<8x64xf32>
    %151 = arith.addf %122, %150 : vector<8x64xf32>
    %c0_97 = arith.constant 0 : index
    %c0_98 = arith.constant 0 : index
    %c0_99 = arith.constant 0 : index
    %152 = vector.load %arg10[%c0_97, %c0_98, %c0_99] : memref<1x8x64xf32, #tpu.memory_space<vmem>>, vector<1x8x64xf32>
    %153 = vector.shape_cast %152 : vector<1x8x64xf32> to vector<8x64xf32>
    %154 = vector.shape_cast %151 : vector<8x64xf32> to vector<1x8x64xf32>
    tpu.vector_store %arg10[%c0_97, %c0_98, %c0_99], %154 {strides = array<i32>} : memref<1x8x64xf32, #tpu.memory_space<vmem>>, vector<1x8x64xf32>,
    return
  }
  func.func @transform_0(%arg0: i32) -> (i32, i32, i32) {
    %c0_i32 = arith.constant 0 : i32
    %c0_i32_0 = arith.constant 0 : i32
    %c0_i32_1 = arith.constant 0 : i32
    return %arg0, %c0_i32, %c0_i32_0 : i32, i32, i32
  }
  func.func @transform_1(%arg0: i32) -> (i32, i32, i32) {
    %c0_i32 = arith.constant 0 : i32
    %c0_i32_0 = arith.constant 0 : i32
    %c0_i32_1 = arith.constant 0 : i32
    %c0_i32_2 = arith.constant 0 : i32
    return %c0_i32, %c0_i32_0, %c0_i32_1 : i32, i32, i32
  }
  func.func @transform_2(%arg0: i32) -> (i32, i32, i32) {
    %c0_i32 = arith.constant 0 : i32
    %c0_i32_0 = arith.constant 0 : i32
    %c0_i32_1 = arith.constant 0 : i32
    %c0_i32_2 = arith.constant 0 : i32
    return %c0_i32, %c0_i32_0, %c0_i32_1 : i32, i32, i32
  }
  func.func @transform_3(%arg0: i32) -> (i32, i32, i32) {
    %c0_i32 = arith.constant 0 : i32
    %c0_i32_0 = arith.constant 0 : i32
    %c0_i32_1 = arith.constant 0 : i32
    %c0_i32_2 = arith.constant 0 : i32
    return %c0_i32, %c0_i32_0, %c0_i32_1 : i32, i32, i32
  }
  func.func @transform_4(%arg0: i32) -> (i32, i32, i32) {
    %c0_i32 = arith.constant 0 : i32
    %c0_i32_0 = arith.constant 0 : i32
    %c0_i32_1 = arith.constant 0 : i32
    %c0_i32_2 = arith.constant 0 : i32
    return %c0_i32, %c0_i32_0, %c0_i32_1 : i32, i32, i32
  }
  func.func @transform_5(%arg0: i32) -> (i32, i32, i32) {
    %c0_i32 = arith.constant 0 : i32
    %c0_i32_0 = arith.constant 0 : i32
    %c0_i32_1 = arith.constant 0 : i32
    %c0_i32_2 = arith.constant 0 : i32
    return %c0_i32, %c0_i32_0, %c0_i32_1 : i32, i32, i32
  }
  func.func @transform_6(%arg0: i32) -> (i32, i32, i32) {
    %c0_i32 = arith.constant 0 : i32
    %c0_i32_0 = arith.constant 0 : i32
    %c0_i32_1 = arith.constant 0 : i32
    %c0_i32_2 = arith.constant 0 : i32
    return %c0_i32, %c0_i32_0, %c0_i32_1 : i32, i32, i32
  }
  func.func @transform_7(%arg0: i32) -> (i32, i32, i32) {
    %c0_i32 = arith.constant 0 : i32
    %c0_i32_0 = arith.constant 0 : i32
    %c0_i32_1 = arith.constant 0 : i32
    return %arg0, %c0_i32, %c0_i32_0 : i32, i32, i32
  }
  func.func @transform_8(%arg0: i32) -> (i32, i32, i32) {
    %c0_i32 = arith.constant 0 : i32
    %c0_i32_0 = arith.constant 0 : i32
    %c0_i32_1 = arith.constant 0 : i32
    return %arg0, %c0_i32, %c0_i32_0 : i32, i32, i32
  }
  func.func @transform_9(%arg0: i32) -> (i32, i32, i32) {
    %c0_i32 = arith.constant 0 : i32
    %c0_i32_0 = arith.constant 0 : i32
    %c0_i32_1 = arith.constant 0 : i32
    return %arg0, %c0_i32, %c0_i32_0 : i32, i32, i32
  }
}

</mosaic_0001>

<bundles_post_ra>
// kernel: tpu_custom_call.1
= control target key start
LH: loop header
LB: loop body
LE: loop exit
PB: predicated region body
PF: predicated region fallthrough
CT: control target
= control target key end

     0   :  { %14 = vsyncpa [#allocation3], 0  ;;  %s2420_s0 = inlined_call_operand.vmem [shape: bf16[2,8,64], index: 0, kind: input, shape index: {}]   ;;  %s2421_s1 = inlined_call_operand.vmem [shape: bf16[4,64,16], index: 1, kind: input, shape index: {}]   ;;  %s2422_s2 = inlined_call_operand.vmem [shape: bf16[4,64,16], index: 2, kind: input, shape index: {}]   ;;  %s2423_s3 = inlined_call_operand.vmem [shape: bf16[2,64,16], index: 3, kind: input, shape index: {}]   ;;  %s2424_s4 = inlined_call_operand.vmem [shape: bf16[2,64,16], index: 4, kind: input, shape index: {}]   ;;  %s2425_s5 = inlined_call_operand.vmem [shape: bf16[2,64,16], index: 5, kind: input, shape index: {}]   ;;  %s2426_s6 = inlined_call_operand.vmem [shape: bf16[4,16,64], index: 6, kind: input, shape index: {}]   ;;  %s2427_s7 = inlined_call_operand.vmem [shape: f32[2,8,16], index: 7, kind: input, shape index: {}]   ;;  %s2428_s8 = inlined_call_operand.vmem [shape: f32[2,8,16], index: 8, kind: input, shape index: {}]   ;;  %s2429_s9 = inlined_call_operand.hbm [shape: f32[2,8,64], index: 9, kind: output, shape index: {}]  }
   0x1   :  { %16 = vsyncpa [#allocation3 + $0x1], 0  ;;  %s2051_s30 = smov 0   ;;  %s2053_s10 = smov 0  }
   0x2   :  { %s2055_s11 = smov 0   ;;  %s2057_s12 = smov 0  }
   0x3 LB: > { %2431 = sst [smem:[#allocation5_spill]] %s1995_s11  ;;  %s2072_s13 = sadd.s32 4294967295, %s1999_s12   ;;  %s1999_s12 = sphi %s2057_s12, %s2439_s12   ;;  %s1995_s11 = sphi %s2055_s11, %s2436_s11   ;;  %s1991_s10 = sphi %s2053_s10, %s2438_s10   ;;  %s1987_s30 = sphi %s2051_s30, %s2437_s30  }
   0x4   : > { %s1462_s14 = sadd.s32 4294967294, %s1999_s12   ;;  %s2076_s15 = sadd.s32 1, %s1999_s12  }
   0x5   : > { %s233_s16 = sadd.s32 1, %s1995_s11  ;;  %s230_s17 = ssub.s32 %s1999_s12, %s2076_s15 }
   0x6   : > { %p243_p0 = scmp.ne.s32.totalorder %s1995_s11, %s1991_s10  ;;  %p231_p1 = scmp.eq.s32.totalorder %s230_s17, 0 }
   0x7   : > { %p244_p2 = scmp.eq.s32.totalorder %s2072_s13, 1  ;;  %p249_p3 = scmp.ne.s32.totalorder %s1991_s10, %s1987_s30 }
   0x8   : > { %p250_p4 = scmp.eq.s32.totalorder %s1462_s14, 1  ;;  %p1465_p7 = scmp.ge.s32.totalorder %s1999_s12, 1 }
   0x9   : > { %s2087_s18 = scalar_select %p231_p1, %s1995_s11, %s233_s16  }
   0xa   : > { %p2089_p5 = por %p244_p2, %p243_p0  ;;  %p2093_p6 = por %p250_p4, %p249_p3 }
   0xb   : > { %2432 = sst [smem:[#allocation6_spill]] %s2087_s18  ;;  %p307_p8 = scmp.lt.s32.totalorder %s1999_s12, 3 }
   0xd   : > { %p308_p9 = pnand %p1465_p7, %p307_p8 }
   0xe   : > { %p350_p10 = scmp.lt.s32.totalorder (!%p308_p9), %s2072_s13, 1  ;;  %s1819_s17 = sshll.u32 (!%p308_p9), %s2072_s13, 3 }
   0xf   : > { %311 = sbr.rel (%p308_p9) target bundleno = 1913 (0x779), region = 56  ;;  %s1957_s16 = scalar_lea.hbm (!%p308_p9), %s2429_s9, 16 }
  0x14   : > { %v1825_v0 = vld [vmem:[%s2423_s3 + $0x18] sm:$0xff]  ;;  %v1824_v3 = vld [vmem:[%s2423_s3 + $0x10] sm:$0xff]  ;;  %s2119_s21 = scalar_select %p350_p10, %s2072_s13, 1  ;;  %v1823_v6 = vld [vmem:[%s2423_s3 + $0x8] sm:$0xff]  ;;  %vm403_vm0 = vcmask 523264   ;;  %vm607_vm1 = vcmask 130048   ;;  %v366_v50 = vlaneseq }
  0x15   : > { %v1829_v1 = vld [vmem:[%s2424_s4 + $0x18] sm:$0xff]  ;;  %411 = vmatpush.bf16.msra.mxu0 %v1825_v0  ;;  %v1828_v4 = vld [vmem:[%s2424_s4 + $0x10] sm:$0xff]  ;;  %v1827_v7 = vld [vmem:[%s2424_s4 + $0x8] sm:$0xff]  ;;  %vm635_vm3 = vcmask 64512   ;;  %vm651_vm4 = vcmask 1043456  }
  0x16   : > { %v1837_v2 = vld [vmem:[%s2421_s1 + $0x18] sm:$0xff]  ;;  %456 = vmatpush.bf16.msra.mxu1 %v1829_v1  ;;  %v1836_v5 = vld [vmem:[%s2421_s1 + $0x10] sm:$0xff]  ;;  %v1835_v8 = vld [vmem:[%s2421_s1 + $0x8] sm:$0xff]  ;;  %s1467_s28 = sshll.u32 %s2119_s21, 2  ;;  %s1468_s23 = sshll.u32 %s2119_s21, 3  ;;  %v2223_v52 = vshrl.u32 %v366_v50, 7 }
  0x17   : > { %550 = vmatpush.bf16.msra.mxu3 %v1837_v2  ;;  %v1822_v9 = vld [vmem:[%s2423_s3] sm:$0xff]  ;;  %s353_s26 = scalar_lea.vmem %s2420_s0, %s1467_s28  ;;  %v1841_v12 = vld [vmem:[%s2422_s2 + $0x18] sm:$0xff]  ;;  %v1840_v15 = vld [vmem:[%s2422_s2 + $0x10] sm:$0xff]  ;;  %s361_s14 = scalar_lea.vmem %s2428_s8, %s1468_s23  ;;  %v2225_v53 = vand.u32 127, %v366_v50 }
  0x18   : > { %v1826_v10 = vld [vmem:[%s2424_s4] sm:$0xff]  ;;  %v1846_v13 = vld [vmem:[%s2421_s1 + $0x38] sm:$0xff]  ;;  %v1845_v16 = vld [vmem:[%s2421_s1 + $0x30] sm:$0xff]  ;;  %s347_s28 = sand.u32 1, %s1991_s10  }
  0x19   : > { %412 = vmatpush.bf16.msra.mxu0 %v1824_v3  ;;  %v1834_v11 = vld [vmem:[%s2421_s1] sm:$0xff]  ;;  %v1839_v17 = vld [vmem:[%s2422_s2 + $0x8] sm:$0xff]  ;;  %v1850_v20 = vld [vmem:[%s2422_s2 + $0x38] sm:$0xff]  ;;  %vm370_vm2 = vcmp.ge.s32.totalorder %v2223_v52, %v2225_v53  ;;  %s1466_s11 = sshll.u32 %s347_s28, 3  ;;  %s1364_s27 = scalar_lea.sflag [#allocation3], %s347_s28 }
  0x1a   : > { %457 = vmatpush.bf16.msra.mxu1 %v1828_v4  ;;  %v2149_v14 = vld [vmem:[%s353_s26] sm:$0xf]  ;;  %v1844_v18 = vld [vmem:[%s2421_s1 + $0x28] sm:$0xff]  ;;  %v1849_v22 = vld [vmem:[%s2422_s2 + $0x30] sm:$0xff]  ;;  %s357_s26 = scalar_lea.vmem %s2427_s7, %s1468_s23  ;;  %s1374_s23 = scalar_lea.hbm %s2429_s9, %s1819_s17 }
  0x1b   : > { %551 = vmatpush.bf16.msra.mxu3 %v1836_v5  ;;  %v1838_v19 = vld [vmem:[%s2422_s2] sm:$0xff]  ;;  %v1848_v23 = vld [vmem:[%s2422_s2 + $0x28] sm:$0xff]  ;;  %v1833_v48 = vld [vmem:[%s2425_s5 + $0x18] sm:$0xff]  ;;  %s349_s24 = scalar_lea.vmem [#allocation2], %s1466_s11 }
  0x1c   : > { %v1843_v21 = vld [vmem:[%s2421_s1 + $0x20] sm:$0xff]  ;;  %504 = vmatpush.bf16.msra.mxu2 %v1833_v48  ;;  %v1832_v49 = vld [vmem:[%s2425_s5 + $0x10] sm:$0xff]  ;;  %v1831_v51 = vld [vmem:[%s2425_s5 + $0x8] sm:$0xff]  ;;  %s1376_s25 = sshll.u32 %s349_s24, 4  ;;  %s1377_s25 = int_to_ptr.vmem [resolvable:$true] %s1376_s25 }
  0x1d   : > { %413 = vmatpush.bf16.msra.mxu0 %v1823_v6  ;;  %v1847_v24 = vld [vmem:[%s2422_s2 + $0x20] sm:$0xff]  ;;  %v1881_v52 = vld [vmem:[%s2426_s6 + $0x18] sm:$0xff] }
  0x1e   : > { %458 = vmatpush.bf16.msra.mxu1 %v1827_v7  ;;  %v2200_v25 = vld [vmem:[%s357_s26] sm:$0xff]  ;;  %s1378_s26 = sshll.u32 %s1374_s23, 4  ;;  %s1379_s26 = int_to_ptr.hbm [resolvable:$true] %s1378_s26 }
  0x1f   : > { %552 = vmatpush.bf16.msra.mxu3 %v1835_v8  ;;  %v2202_v26 = vld [vmem:[%s361_s14] sm:$0xff]  ;;  %s1951_s29 = sshra.s32 %s1379_s26, 4  ;;  %s1952_s29 = int_to_ptr.hbm [resolvable:$true] %s1951_s29 }
  0x20   : > { %505 = vmatpush.bf16.msra.mxu2 %v1832_v49  ;;  %v1830_v54 = vld [vmem:[%s2425_s5] sm:$0xff]  ;;  %s1953_s14 = scalar_lea.hbm %s1952_s29, 8  ;;  %p1958_p0 = scmp.lt.s32.totalorder %s1952_s29, %s2429_s9 }
  0x21   : > { %414 = vmatpush.bf16.msra.mxu0 %v1822_v9  ;;  %p1954_p11 = scmp.ne.s32.totalorder %s1952_s29, %s1953_s14  ;;  %p1959_p1 = scmp.lt.s32.totalorder %s1957_s16, %s1953_s14 }
  0x22   : > { %459 = vmatpush.bf16.msra.mxu1 %v1826_v10 }
  0x23   : > { %553 = vmatpush.bf16.msra.mxu3 %v1834_v11  ;;  %v1855_v11 = vld [vmem:[%s2423_s3 + $0x38] sm:$0xff]  ;;  %p1955_p12 = pnand %p1954_p11, %p2089_p5  ;;  %p1960_p2 = por %p1959_p1, %p1958_p0 }
  0x24   : > { %1486 = vmatmul.msk.bf16.vlgmr.msra.gmra.mxu0 %vm403_vm0, %v2149_v14  ;;  %506 = vmatpush.bf16.msra.mxu2 %v1831_v51 }
  0x25   : > { %595 = vmatpush.bf16.msrb.mxu0 %v1841_v12  ;;  %1503 = vmatmul.msk.bf16.vlgmr.msra.gmra.mxu1 %vm403_vm0, %v2149_v14  ;;  %v1859_v12 = vld [vmem:[%s2424_s4 + $0x38] sm:$0xff]  ;;  %p1956_p13 = pneg %p1955_p12 }
  0x26   : > { %1537 = vmatmul.msk.bf16.vlgmr.msra.gmra.mxu3 %vm403_vm0, %v2149_v14 }
  0x27   : > { %708 = vmatpush.bf16.msrb.mxu3 %v1846_v13  ;;  %v1842_v13 = vld [vmem:[%s2426_s6] sm:$0xff]  ;;  %p1961_p3 = pnand %p1960_p2, %p1956_p13 }
  0x28   : > { %507 = vmatpush.bf16.msra.mxu2 %v1830_v54 }
  0x29   : > { %596 = vmatpush.bf16.msrb.mxu0 %v1840_v15  ;;  %v1854_v15 = vld [vmem:[%s2423_s3 + $0x30] sm:$0xff] }
  0x2b   : > { %709 = vmatpush.bf16.msrb.mxu3 %v1845_v16  ;;  %1520 = vmatmul.msk.bf16.vlgmr.msra.gmra.mxu2 %vm403_vm0, %v2149_v14  ;;  %v1858_v16 = vld [vmem:[%s2424_s4 + $0x30] sm:$0xff] }
  0x2d   : > { %597 = vmatpush.bf16.msrb.mxu0 %v1839_v17 }
  0x2f   : > { %710 = vmatpush.bf16.msrb.mxu3 %v1844_v18  ;;  %v1853_v18 = vld [vmem:[%s2423_s3 + $0x28] sm:$0xff] }
  0x31   : > { %598 = vmatpush.bf16.msrb.mxu0 %v1838_v19  ;;  %v1857_v19 = vld [vmem:[%s2424_s4 + $0x28] sm:$0xff] }
  0x33   : > { %711 = vmatpush.bf16.msrb.mxu3 %v1843_v21  ;;  %v1856_v21 = vld [vmem:[%s2424_s4 + $0x20] sm:$0xff] }
  0x34   : > { %1554 = vmatmul.msk.bf16.vlgmr.msrb.gmra.mxu0 %vm403_vm0, %v2149_v14 }
  0x35   : > { %754 = vmatpush.bf16.msra.mxu0 %v1850_v20  ;;  %v1852_v20 = vld [vmem:[%s2423_s3 + $0x20] sm:$0xff] }
  0x36   : > { %1582 = vmatmul.msk.bf16.vlgmr.msrb.gmra.mxu3 %vm403_vm0, %v2149_v14 }
  0x37   : > { %860 = vmatpush.bf16.msra.mxu3 %v1842_v13 }
  0x39   : > { %755 = vmatpush.bf16.msra.mxu0 %v1849_v22 }
  0x3d   : > { %756 = vmatpush.bf16.msra.mxu0 %v1848_v23 }
  0x41   : > { %757 = vmatpush.bf16.msra.mxu0 %v1847_v24 }
  0x44   : > { %1607 = vmatmul.msk.bf16.vlgmr.msra.gmra.mxu0 %vm403_vm0, %v2149_v14 }
  0x45   : > { %903 = vmatpush.bf16.msrb.mxu0 %v1855_v11 }
  0x49   : > { %904 = vmatpush.bf16.msrb.mxu0 %v1854_v15  ;;  %v1876_v15 = vld [vmem:[%s2421_s1 + $0x78] sm:$0xff] }
  0x4d   : > { %905 = vmatpush.bf16.msrb.mxu0 %v1853_v18  ;;  %v1879_v18 = vld [vmem:[%s2422_s2 + $0x70] sm:$0xff] }
  0x51   : > { %906 = vmatpush.bf16.msrb.mxu0 %v1852_v20  ;;  %v1878_v20 = vld [vmem:[%s2422_s2 + $0x68] sm:$0xff] }
  0x54   : > { %1647 = vmatmul.msk.bf16.vlgmr.msrb.gmra.mxu0 %vm403_vm0, %v2149_v14 }
  0xa1   : > { %v416_v27 = vpop.f32.mrf.mxu0 }
  0xa2   : > { %v461_v28 = vpop.f32.mrf.mxu1  ;;  %v465_v29 = vmul.f32 %v416_v27, %v2200_v25 }
  0xa3   : > { %v466_v30 = vmul.f32 %v461_v28, %v2202_v26 }
  0xa5   : > { %v467_v31 = vadd.f32 %v466_v30, %v465_v29 }
  0xa7   : > { %1555 = vmatpush.xpose.msk.msrb.mxu1 %vm607_vm1, %v467_v31 }
  0xa9   : > { %v555_v32 = vpop.f32.mrf.mxu3  ;;  %v418_v33 = vpop.f32.mrf.mxu0 }
  0xaa   : > { %v463_v34 = vpop.f32.mrf.mxu1  ;;  %v604_v35 = vmul.f32 %v555_v32, %v2200_v25  ;;  %v1867_v32 = vld [vmem:[%s2421_s1 + $0x58] sm:$0xff]  ;;  %v1870_v33 = vld [vmem:[%s2422_s2 + $0x50] sm:$0xff] }
  0xab   : > { %1608 = vmatpush.xpose.msk.msra.mxu1 %vm607_vm1, %v467_v31  ;;  %v1871_v31 = vld [vmem:[%s2422_s2 + $0x58] sm:$0xff]  ;;  %1045 = vmatpush.bf16.msrb.mxu3 %v1867_v32  ;;  %v1866_v34 = vld [vmem:[%s2421_s1 + $0x50] sm:$0xff] }
  0xac   : > { %1091 = vmatpush.bf16.msra.mxu0 %v1871_v31 }
  0xae   : > { %v509_v4 = vpop.f32.mrf.mxu2 }
  0xaf   : > { %v513_v5 = vpack.c.bf16 %v509_v4, %v509_v4  ;;  %1046 = vmatpush.bf16.msrb.mxu3 %v1866_v34 }
  0xb0   : > { %1092 = vmatpush.bf16.msra.mxu0 %v1870_v33 }
  0xb1   : > { %v557_v36 = vpop.f32.mrf.mxu3  ;;  %v600_v37 = vpop.f32.mrf.mxu0  ;;  %v653_v7 = vsel %vm651_vm4, %v513_v5, 0 }
  0xb2   : > { %v605_v38 = vmul.f32 %v600_v37, %v2202_v26  ;;  %662 = vmatpush.bf16.msrb.mxu2 %v653_v7  ;;  %v1869_v36 = vld [vmem:[%s2422_s2 + $0x48] sm:$0xff] }
  0xb3   : > { %v1865_v37 = vld [vmem:[%s2421_s1 + $0x48] sm:$0xff] }
  0xb4   : > { %v606_v39 = vadd.f32 %v605_v38, %v604_v35  ;;  %v1851_v35 = vld [vmem:[%s2426_s6 + $0x8] sm:$0xff]  ;;  %1093 = vmatpush.bf16.msra.mxu0 %v1869_v36  ;;  %1047 = vmatpush.bf16.msrb.mxu3 %v1865_v37  ;;  %v1863_v38 = vld [vmem:[%s2425_s5 + $0x38] sm:$0xff] }
  0xb6   : > { %1556 = vmatmul.msk.f32.vlgmr.msrb.gmra.mxu1 %vm607_vm1, %v606_v39  ;;  %v511_v8 = vpop.f32.mrf.mxu2  ;;  %838 = vmatpush.bf16.msra.mxu2 %v1851_v35  ;;  %v1868_v39 = vld [vmem:[%s2422_s2 + $0x40] sm:$0xff] }
  0xb7   : > { %812 = vmatpush.bf16.msrb.mxu1 %v653_v7 }
  0xb8   : > { %1094 = vmatpush.bf16.msra.mxu0 %v1868_v39 }
  0xb9   : > { %v713_v40 = vpop.f32.mrf.mxu3  ;;  %v602_v41 = vpop.f32.mrf.mxu0 }
  0xba   : > { %v763_v42 = vmul.f32 %v713_v40, %v2200_v25  ;;  %v1864_v40 = vld [vmem:[%s2421_s1 + $0x40] sm:$0xff]  ;;  %v1862_v41 = vld [vmem:[%s2425_s5 + $0x30] sm:$0xff] }
  0xbb   : > { %1048 = vmatpush.bf16.msrb.mxu3 %v1864_v40  ;;  %1747 = vmatmul.msk.bf16.vlgmr.msra.gmra.mxu0 %vm403_vm0, %v2149_v14 }
  0xbc   : > { %1225 = vmatpush.bf16.msrb.mxu0 %v1876_v15 }
  0xc1   : > { %v715_v43 = vpop.f32.mrf.mxu3  ;;  %v759_v44 = vpop.f32.mrf.mxu0 }
  0xc2   : > { %v764_v45 = vmul.f32 %v759_v44, %v2202_v26  ;;  %v1860_v43 = vld [vmem:[%s2425_s5 + $0x20] sm:$0xff] }
  0xc4   : > { %v765_v46 = vadd.f32 %v764_v45, %v763_v42  ;;  %v1861_v42 = vld [vmem:[%s2425_s5 + $0x28] sm:$0xff] }
  0xc6   : > { %1609 = vmatmul.msk.f32.vlgmr.msra.gmra.mxu1 %vm607_vm1, %v765_v46 }
  0xc7   : > { %949 = vmatpush.bf16.msra.mxu1 %v1859_v12 }
  0xc9   : > { %v761_v47 = vpop.f32.mrf.mxu0 }
  0xcb   : > { %950 = vmatpush.bf16.msra.mxu1 %v1858_v16  ;;  %v1880_v16 = vld [vmem:[%s2422_s2 + $0x78] sm:$0xff] }
  0xcf   : > { %951 = vmatpush.bf16.msra.mxu1 %v1857_v19  ;;  %v1874_v19 = vld [vmem:[%s2421_s1 + $0x68] sm:$0xff] }
  0xd1   : > { %v908_v44 = vpop.f32.mrf.mxu0 }
  0xd2   : > { %v958_v54 = vmul.f32 %v908_v44, %v2200_v25 }
  0xd3   : > { %952 = vmatpush.bf16.msra.mxu1 %v1856_v21  ;;  %v1873_v21 = vld [vmem:[%s2421_s1 + $0x60] sm:$0xff] }
  0xd9   : > { %v910_v47 = vpop.f32.mrf.mxu0 }
 0x133   : > { %v631_v55 = vpop.f32.mrf.mxu1 }
 0x134   : > { %v634_v56 = vsel %vm370_vm2, %v631_v55, -1e+30 }
 0x135   : > { %v636_v57 = vsel %vm635_vm3, %v634_v56, -inf }
 0x136   : > { %637 = vmax.xlane.f32.xlu0 %v636_v57 }
 0x143   : > { %v786_v58 = vpop.f32.mrf.mxu1 }
 0x144   : > { %v789_v59 = vsel %vm370_vm2, %v786_v58, -1e+30 }
 0x145   : > { %v790_v60 = vsel %vm635_vm3, %v789_v59, -inf }
 0x146   : > { %791 = vmax.xlane.f32.xlu1 %v790_v60 }
 0x1a9   : > { %v638_v61 = vpop.xlane.xlu0 %637 }
 0x1aa   : > { %v639_v62 = vsub.f32 %v634_v56, %v638_v61 }
 0x1ac   : > { %v640_v63 = vmul.f32 1.442695, %v639_v62 }
 0x1ae   : > { %1921 = vpow2.f32 %v640_v63 }
 0x1b4   : > { %v1922_v0 = vpop.eup %1921 }
 0x1b5   : > { %v642_v1 = vsel %vm635_vm3, %v1922_v0, 0.0 }
 0x1b6   : > { %643 = vadd.xlane.f32.xlu0 %v642_v1 }
 0x1b9   : > { %v792_v2 = vpop.xlane.xlu1 %791 }
 0x1ba   : > { %v793_v3 = vsub.f32 %v789_v59, %v792_v2  ;;  %v1096_v59 = vpop.f32.mrf.mxu0 }
 0x1bb   : > { %v1101_v1 = vmul.f32 %v1096_v59, %v2202_v26 }
 0x1bc   : > { %v794_v6 = vmul.f32 1.442695, %v793_v3 }
 0x1be   : > { %1923 = vpow2.f32 %v794_v6 }
 0x1c2   : > { %v1098_v60 = vpop.f32.mrf.mxu0 }
 0x1c4   : > { %v1924_v9 = vpop.eup %1923 }
 0x1c5   : > { %v796_v10 = vsel %vm635_vm3, %v1924_v9, 0.0 }
 0x1c6   : > { %797 = vadd.xlane.f32.xlu1 %v796_v10 }
 0x229   : > { %v644_v17 = vpop.xlane.xlu0 %643 }
 0x22a   : > { %1925 = vrcp.f32 %v644_v17  ;;  %v1875_v17 = vld [vmem:[%s2421_s1 + $0x70] sm:$0xff] }
 0x22b   : > { %1226 = vmatpush.bf16.msrb.mxu0 %v1875_v17 }
 0x22f   : > { %1227 = vmatpush.bf16.msrb.mxu0 %v1874_v19 }
 0x230   : > { %v1926_v22 = vpop.eup %1925 }
 0x231   : > { %v646_v23 = vmul.f32 %v1926_v22, %v1922_v0  ;;  %v1877_v22 = vld [vmem:[%s2422_s2 + $0x60] sm:$0xff] }
 0x233   : > { %v647_v24 = vpack.c.bf16 %v646_v23, %v646_v23  ;;  %v1872_v23 = vld [vmem:[%s2426_s6 + $0x10] sm:$0xff]  ;;  %1228 = vmatpush.bf16.msrb.mxu0 %v1873_v21 }
 0x235   : > { %1557 = vmatmul.msk.bf16.vlgmr.msrb.gmra.mxu2 %vm635_vm3, %v647_v24 }
 0x236   : > { %998 = vmatpush.bf16.msrb.mxu2 %v1863_v38  ;;  %1782 = vmatmul.msk.bf16.vlgmr.msrb.gmra.mxu0 %vm403_vm0, %v2149_v14 }
 0x239   : > { %v798_v27 = vpop.xlane.xlu1 %797 }
 0x23a   : > { %1927 = vrcp.f32 %v798_v27  ;;  %999 = vmatpush.bf16.msrb.mxu2 %v1862_v41 }
 0x23e   : > { %1000 = vmatpush.bf16.msrb.mxu2 %v1861_v42 }
 0x240   : > { %v1928_v28 = vpop.eup %1927 }
 0x241   : > { %v800_v29 = vmul.f32 %v1928_v28, %v1924_v9 }
 0x242   : > { %1001 = vmatpush.bf16.msrb.mxu2 %v1860_v43 }
 0x243   : > { %v801_v30 = vpack.c.bf16 %v800_v29, %v800_v29 }
 0x245   : > { %1610 = vmatmul.msk.bf16.vlgmr.msrb.gmra.mxu1 %vm635_vm3, %v801_v30 }
 0x255   : > { %1672 = vmatmul.msk.bf16.vlgmr.msra.gmra.mxu1 %vm403_vm0, %v2149_v14 }
 0x2b3   : > { %v1230_v31 = vpop.f32.mrf.mxu0 }
 0x2b8   : > { %v664_v45 = vpop.f32.mrf.mxu2 }
 0x2b9   : > { %v668_v46 = vpack.c.bf16 %v664_v45, %v664_v45 }
 0x2bb   : > { %1622 = vmatmul.msk.bf16.vlgmr.msra.gmra.mxu3 %vm607_vm1, %v668_v46  ;;  %v1232_v33 = vpop.f32.mrf.mxu0 }
 0x2bc   : > { %1181 = vmatpush.bf16.msra.mxu3 %v1872_v23 }
 0x2c0   : > { %v666_v48 = vpop.f32.mrf.mxu2 }
 0x2c2   : > { %v814_v49 = vpop.f32.mrf.mxu1 }
 0x2c3   : > { %v818_v50 = vpack.c.bf16 %v814_v49, %v814_v49 }
 0x2c5   : > { %1617 = vmatmul.msk.bf16.vlgmr.msra.gmra.mxu2 %vm607_vm1, %v818_v50 }
 0x2ca   : > { %v816_v51 = vpop.f32.mrf.mxu1 }
 0x2cb   : > { %1722 = vmatmul.msk.bf16.vlgmr.msrb.gmra.mxu3 %vm403_vm0, %v2149_v14 }
 0x2d2   : > { %v954_v55 = vpop.f32.mrf.mxu1 }
 0x2d3   : > { %v959_v56 = vmul.f32 %v954_v55, %v2202_v26 }
 0x2d5   : > { %1697 = vmatmul.msk.bf16.vlgmr.msrb.gmra.mxu2 %vm403_vm0, %v2149_v14  ;;  %v960_v57 = vadd.f32 %v959_v56, %v958_v54 }
 0x2d7   : > { %1748 = vmatpush.xpose.msk.msrb.mxu1 %vm607_vm1, %v960_v57 }
 0x2da   : > { %v956_v58 = vpop.f32.mrf.mxu1 }
 0x2db   : > { %1271 = vmatpush.bf16.msra.mxu1 %v1880_v16 }
 0x2df   : > { %1272 = vmatpush.bf16.msra.mxu1 %v1879_v18 }
 0x2e3   : > { %1273 = vmatpush.bf16.msra.mxu1 %v1878_v20 }
 0x2e7   : > { %1274 = vmatpush.bf16.msra.mxu1 %v1877_v22 }
 0x33e   : > { %v862_v61 = vpop.f32.mrf.mxu3 }
 0x346   : > { %v864_v62 = vpop.f32.mrf.mxu3 }
 0x348   : > { %v840_v63 = vpop.f32.mrf.mxu2 }
 0x349   : > { %v2328_v0 = vadd.f32 %v862_v61, %v840_v63 }
 0x34e   : > { %v1050_v2 = vpop.f32.mrf.mxu3 }
 0x34f   : > { %v1100_v3 = vmul.f32 %v1050_v2, %v2200_v25 }
 0x350   : > { %v842_v4 = vpop.f32.mrf.mxu2 }
 0x351   : > { %v1102_v5 = vadd.f32 %v1101_v1, %v1100_v3 }
 0x353   : > { %1749 = vmatmul.msk.f32.vlgmr.msrb.gmra.mxu1 %vm607_vm1, %v1102_v5 }
 0x356   : > { %v1052_v6 = vpop.f32.mrf.mxu3 }
 0x358   : > { %v1003_v7 = vpop.f32.mrf.mxu2 }
 0x359   : > { %v1007_v8 = vpack.c.bf16 %v1003_v7, %v1003_v7 }
 0x35b   : > { %v1146_v9 = vsel %vm651_vm4, %v1007_v8, 0  ;;  %1807 = vmatmul.msk.bf16.vlgmr.msra.gmra.mxu1 %vm403_vm0, %v2149_v14  ;;  %v1280_v14 = vmul.f32 %v1230_v31, %v2200_v25 }
 0x35c   : > { %1155 = vmatpush.bf16.msra.mxu2 %v1146_v9  ;;  %1329 = vmatpush.bf16.msrb.mxu3 %v1146_v9 }
 0x360   : > { %1808 = vmatpush.xpose.msk.msrb.mxu2 %vm607_vm1, %v960_v57  ;;  %v1005_v10 = vpop.f32.mrf.mxu2 }
 0x3d0   : > { %v1126_v11 = vpop.f32.mrf.mxu1 }
 0x3d1   : > { %v1129_v12 = vsel %vm370_vm2, %v1126_v11, -1e+30 }
 0x3d2   : > { %v1130_v13 = vsel %vm635_vm3, %v1129_v12, -inf }
 0x3d3   : > { %1131 = vmax.xlane.f32.xlu2 %v1130_v13 }
 0x3d8   : > { %v1276_v32 = vpop.f32.mrf.mxu1 }
 0x3d9   : > { %v1281_v39 = vmul.f32 %v1276_v32, %v2202_v26 }
 0x3db   : > { %v1282_v40 = vadd.f32 %v1281_v39, %v1280_v14 }
 0x3e0   : > { %v1278_v34 = vpop.f32.mrf.mxu1 }
 0x446   : > { %v1132_v24 = vpop.xlane.xlu2 %1131 }
 0x447   : > { %v1133_v27 = vsub.f32 %v1129_v12, %v1132_v24 }
 0x449   : > { %v1134_v28 = vmul.f32 1.442695, %v1133_v27 }
 0x44b   : > { %1929 = vpow2.f32 %v1134_v28 }
 0x451   : > { %v1930_v29 = vpop.eup %1929 }
 0x452   : > { %v1136_v30 = vsel %vm635_vm3, %v1930_v29, 0.0 }
 0x453   : > { %1137 = vadd.xlane.f32.xlu2 %v1136_v30 }
 0x4c6   : > { %v1138_v35 = vpop.xlane.xlu2 %1137 }
 0x4c7   : > { %1931 = vrcp.f32 %v1138_v35 }
 0x4cd   : > { %v1932_v36 = vpop.eup %1931 }
 0x4ce   : > { %v1140_v37 = vmul.f32 %v1932_v36, %v1930_v29 }
 0x4d0   : > { %v1141_v38 = vpack.c.bf16 %v1140_v37, %v1140_v37 }
 0x4d2   : > { %1750 = vmatmul.msk.bf16.vlgmr.msra.gmra.mxu2 %vm635_vm3, %v1141_v38 }
 0x4d3   : > { %1355 = vmatpush.bf16.msra.mxu2 %v1881_v52 }
 0x4e2   : > { %1809 = vmatmul.msk.f32.vlgmr.msrb.gmra.mxu2 %vm607_vm1, %v1282_v40 }
 0x555   : > { %v1157_v41 = vpop.f32.mrf.mxu2 }
 0x556   : > { %v1161_v42 = vpack.c.bf16 %v1157_v41, %v1157_v41 }
 0x558   : > { %1757 = vmatmul.msk.bf16.vlgmr.msra.gmra.mxu3 %vm607_vm1, %v1161_v42 }
 0x55d   : > { %v1159_v43 = vpop.f32.mrf.mxu2 }
 0x565   : > { %v1303_v44 = vpop.f32.mrf.mxu2 }
 0x566   : > { %v1306_v45 = vsel %vm370_vm2, %v1303_v44, -1e+30 }
 0x567   : > { %v1307_v46 = vsel %vm635_vm3, %v1306_v45, -inf }
 0x568   : > { %1308 = vmax.xlane.f32.xlu0 %v1307_v46 }
 0x5db   : > { %v1183_v47 = vpop.f32.mrf.mxu3  ;;  %v1309_v25 = vpop.xlane.xlu0 %1308 }
 0x5dc   : > { %v1187_v26 = vadd.f32 %v1183_v47, %v2328_v0  ;;  %v1310_v48 = vsub.f32 %v1306_v45, %v1309_v25 }
 0x5de   : > { %v1311_v49 = vmul.f32 1.442695, %v1310_v48 }
 0x5e0   : > { %1933 = vpow2.f32 %v1311_v49 }
 0x5e3   : > { %v1185_v50 = vpop.f32.mrf.mxu3 }
 0x5e6   : > { %v1934_v51 = vpop.eup %1933 }
 0x5e7   : > { %v1313_v54 = vsel %vm635_vm3, %v1934_v51, 0.0 }
 0x5e8   : > { %1314 = vadd.xlane.f32.xlu1 %v1313_v54 }
 0x65b   : > { %v1315_v53 = vpop.xlane.xlu1 %1314 }
 0x65c   : > { %1935 = vrcp.f32 %v1315_v53 }
 0x662   : > { %v1936_v55 = vpop.eup %1935 }
 0x663   : > { %v1317_v56 = vmul.f32 %v1936_v55, %v1934_v51 }
 0x665   : > { %v1318_v57 = vpack.c.bf16 %v1317_v56, %v1317_v56 }
 0x667   : > { %1810 = vmatmul.msk.bf16.vlgmr.msrb.gmra.mxu3 %vm635_vm3, %v1318_v57 }
 0x6ea   : > { %v1331_v58 = vpop.f32.mrf.mxu3 }
 0x6eb   : > { %v1335_v59 = vpack.c.bf16 %v1331_v58, %v1331_v58 }
 0x6ed   : > { %1817 = vmatmul.msk.bf16.vlgmr.msra.gmra.mxu2 %vm607_vm1, %v1335_v59 }
 0x6f2   : > { %v1333_v60 = vpop.f32.mrf.mxu3 }
 0x770   : > { %v1357_v61 = vpop.f32.mrf.mxu2 }
 0x771   : > { %v1361_v62 = vadd.f32 %v1357_v61, %v1187_v26 }
 0x773   : > { %1362 = vst.msk [vmem:[%s349_s24] sm:$0xff] %vm403_vm0, %v1361_v62 }
 0x774   : > { %1964 = shalt.err (!%p1961_p3)
}
 0x775   : > { %1882 = dma.vmem_to_hbm [thread:$0]  (%p2089_p5), %s1377_s25, 128, %s1379_s26, %s1364_s27  }
 0x778   : > { %v1359_v63 = vpop.f32.mrf.mxu2 }
 0x779 PF: > { %p1888_p4 = scmp.ge.s32.totalorder %s1999_s12, 2  ;;  %s1390_s28 = sand.u32 1, %s1987_s30  }
 0x77a   : > { %s1391_s18 = scalar_lea.sflag [#allocation3], %s1390_s28 }
 0x77b   : > { %p1885_p7 = pnand %p1888_p4, %p2093_p6 }
 0x77d   : > { %p1886_p8 = pneg %p1885_p7 }
 0x77f   : > { %1982 = dma.done.wait (%p1886_p8), %s1391_s18, 128  }
 0x780   : > { %1984 = vsyncadd (%p1886_p8), %s1391_s18, 4294967168  ;;  %s2435_s22 = sld [smem:[#allocation5_spill]]  ;;  %p19_p9 = scmp.ge.s32.totalorder %s2076_s15, 4  }
 0x781   : > { %s2436_s11 = sld [smem:[#allocation6_spill]]  ;;  %s2437_s30 = smov %s1991_s10 }
 0x782   : > { %s2439_s12 = smov %s2076_s15  ;;  %21 = sbr.rel (!%p19_p9) target bundleno = 3 (0x3), region = 109 }
 0x786   : > { %s2438_s10 = smov %s2435_s22 }
 0x787   :  { %1397 = vsyncpa [#allocation3], 1 }
 0x788   :  { %1399 = vsyncpa [#allocation3 + $0x1], 1 }

</bundles_post_ra>
